<compile_context>
chip_gen: v7x
topology: tpu7x:2x2x1
jax: 0.10.0
libtpu: 0.0.40
codegen_flags: <defaults>
</compile_context>

<pallas_src>
import jax
import jax.numpy as jnp
from jax.experimental import pallas as pl
from jax.experimental.pallas import tpu as pltpu


def _round_up(x, m):
    return ((x + m - 1) // m) * m


def _cdiv(a, b):
    return (a + b - 1) // b


def reghead_tile_kernel(xc_ref, xp_ref, xn_ref, mc_ref, mp_ref, mn_ref,
                        w1_ref, b1_ref, w2_ref, b2_ref, w3_ref, b3_ref,
                        scale_ref, out_ref):
    i = pl.program_id(0)
    n = pl.num_programs(0)

    B, Tt, Cin = xc_ref.shape
    HALO = xp_ref.shape[1]           # 16 halo rows per side (one halo block)
    K = w1_ref.shape[0] // Cin       # conv kernel size (static)
    pad = K // 2
    E1, E2 = HALO // 2, HALO // 4    # extra rows kept after conv1 / conv2

    scale = scale_ref[0]             # per-level Scale() scalar (SMEM)

    # Halo chunks come from the neighbouring time tiles.  At level edges the
    # fetched (clamped) chunks are forced to zero: zero feat halo == the
    # reference's zero conv padding; zero mask halo zeroes h/h2 rows outside
    # the level, matching torch's implicit zero pad of the intermediates.
    xprev, xnext = xp_ref[...], xn_ref[...]
    mprev, mnext = mp_ref[...], mn_ref[...]
    xprev = jnp.where(i > 0, xprev, jnp.zeros_like(xprev))
    mprev = jnp.where(i > 0, mprev, jnp.zeros_like(mprev))
    xnext = jnp.where(i < n - 1, xnext, jnp.zeros_like(xnext))
    mnext = jnp.where(i < n - 1, mnext, jnp.zeros_like(mnext))

    # (B, Tt + 2*HALO, C) working window (replaces per-layer zrow concats).
    x_win = jnp.concatenate([xprev, xc_ref[...], xnext], axis=1)   # bf16
    m_win = jnp.concatenate([mprev, mc_ref[...], mnext], axis=1)   # f32

    def conv3tap(act, base, w_ref, b_ref, L):
        # 'valid' K-tap conv producing L rows starting at row `base` of `act`,
        # as ONE im2col MXU matmul with f32 accumulation; bias added once.
        c = act.shape[-1]
        cols = jnp.concatenate(
            [act[:, base - pad + k: base - pad + k + L, :] for k in range(K)],
            axis=-1)                                        # (B, L, K*c)
        cols = cols.reshape(B * L, K * c).astype(jnp.bfloat16)
        y = jnp.dot(cols, w_ref[...], preferred_element_type=jnp.float32)
        return (y + b_ref[...]).reshape(B, L, -1)           # f32

    # head[0]: MaskedConv1D -> Identity -> ReLU   (keep E1 extra rows/side)
    L1 = Tt + 2 * E1
    m1 = m_win[:, HALO - E1: HALO - E1 + L1, :]
    h = jnp.maximum(conv3tap(x_win, HALO - E1, w1_ref, b1_ref, L1) * m1,
                    0.0).astype(jnp.bfloat16)

    # head[1]: MaskedConv1D -> Identity -> ReLU   (keep E2 extra rows/side)
    L2 = Tt + 2 * E2
    m2 = m_win[:, HALO - E2: HALO - E2 + L2, :]
    h2 = jnp.maximum(conv3tap(h, E1 - E2, w2_ref, b2_ref, L2) * m2,
                     0.0).astype(jnp.bfloat16)

    # offset head: MaskedConv1D (mask first), then Scale(), then F.relu
    m3 = m_win[:, HALO: HALO + Tt, :]
    o = conv3tap(h2, E2, w3_ref, b3_ref, Tt) * m3
    out_ref[...] = jnp.maximum(o * scale, 0.0).astype(out_ref.dtype)


def ccnet_reghead_forward(fpn_feats, fpn_masks, params, scales,
                          *, max_time_tile=512):
    """fpn_feats[l]: (B, T_l, Cin); fpn_masks[l]: (B, T_l, 1). One launch per level."""
    assert len(fpn_feats) == len(fpn_masks) == len(scales)
    w1, b1, w2, b2, w3, b3 = params
    K, Cin, Fd = w1.shape
    Cout = w3.shape[2]
    assert K % 2 == 1 and K // 2 <= 4, "kernel supports odd K <= 9"

    HALO = 16                                    # halo rows/side; >= 3*(K//2)
    max_time_tile = max(16, _round_up(max_time_tile, 16))

    # im2col weight layout (K*Cin, Cout); bf16 operands for the MXU.
    w1c = w1.reshape(K * Cin, Fd).astype(jnp.bfloat16)
    w2c = w2.reshape(K * Fd, Fd).astype(jnp.bfloat16)
    w3c = w3.reshape(K * Fd, Cout).astype(jnp.bfloat16)
    b1f = b1.reshape(1, Fd).astype(jnp.float32)
    b2f = b2.reshape(1, Fd).astype(jnp.float32)
    b3f = b3.reshape(1, Cout).astype(jnp.float32)

    outs = []
    for l, (x, m) in enumerate(zip(fpn_feats, fpn_masks)):
        B, T, _ = x.shape

        # Ragged per-level tiling: each level gets its own tile size / grid.
        T16 = _round_up(T, 16)
        n_hint = max(1, _cdiv(T16, max_time_tile))
        Ttile = _round_up(_cdiv(T16, n_hint), 16)
        n_tiles = _cdiv(T16, Ttile)
        T_round = n_tiles * Ttile

        # Pad only to this level's tile multiple (single jnp.pad, no
        # .at[].set HBM round trip); feats go to HBM as bf16.
        xpad = jnp.pad(x.astype(jnp.bfloat16),
                       ((0, 0), (0, T_round - T), (0, 0)))
        mpad = jnp.pad(m.astype(jnp.float32),
                       ((0, 0), (0, T_round - T), (0, 0)))
        scale_arr = jnp.asarray(scales[l], jnp.float32).reshape(1)

        tpb = Ttile // HALO           # halo-blocks per time tile
        nhb = T_round // HALO         # total halo-blocks in this level

        core = lambda i: (0, i, 0)
        prev = lambda i: (0, jnp.maximum(i * tpb - 1, 0), 0)
        nxt = lambda i: (0, jnp.minimum((i + 1) * tpb, nhb - 1), 0)

        out = pl.pallas_call(
            reghead_tile_kernel,
            out_shape=jax.ShapeDtypeStruct((B, T_round, Cout), jnp.float32),
            grid=(n_tiles,),
            in_specs=[
                pl.BlockSpec((B, Ttile, Cin), core),   # current time tile
                pl.BlockSpec((B, HALO, Cin), prev),    # 16-row backward halo
                pl.BlockSpec((B, HALO, Cin), nxt),     # 16-row forward halo
                pl.BlockSpec((B, Ttile, 1), core),
                pl.BlockSpec((B, HALO, 1), prev),
                pl.BlockSpec((B, HALO, 1), nxt),
                pl.BlockSpec((K * Cin, Fd), lambda i: (0, 0)),
                pl.BlockSpec((1, Fd), lambda i: (0, 0)),
                pl.BlockSpec((K * Fd, Fd), lambda i: (0, 0)),
                pl.BlockSpec((1, Fd), lambda i: (0, 0)),
                pl.BlockSpec((K * Fd, Cout), lambda i: (0, 0)),
                pl.BlockSpec((1, Cout), lambda i: (0, 0)),
                pl.BlockSpec(memory_space=pltpu.MemorySpace.SMEM),
            ],
            out_specs=pl.BlockSpec((B, Ttile, Cout), core),
            compiler_params=pltpu.CompilerParams(
                dimension_semantics=("parallel",),       # megacore over tiles
                vmem_limit_bytes=32 * 1024 * 1024),      # fits v5e..v7x
        )(xpad, xpad, xpad, mpad, mpad, mpad,
          w1c, b1f, w2c, b2f, w3c, b3f, scale_arr)

        outs.append(out[:, :T, :])
    return tuple(outs)


# ---------------- pure-JAX reference (for correctness check) ----------------
def _ref_conv1d(x, w, b):
    B, T, Cin = x.shape
    K, _, Cout = w.shape
    pad = K // 2
    xp = jnp.pad(x, ((0, 0), (pad, pad), (0, 0)))
    acc = jnp.zeros((B, T, Cout), jnp.float32) + b.reshape(1, 1, Cout)
    for k in range(K):
        acc = acc + jnp.einsum(
            'btc,cd->btd',
            xp[:, k:k + T].astype(jnp.bfloat16),
            w[k].astype(jnp.bfloat16),
            preferred_element_type=jnp.float32)
    return acc


def ref_forward(fpn_feats, fpn_masks, params, scales):
    w1, b1, w2, b2, w3, b3 = params
    outs = []
    for l, (x, m) in enumerate(zip(fpn_feats, fpn_masks)):
        m = m.astype(jnp.float32)
        h = jax.nn.relu(_ref_conv1d(x, w1, b1) * m)
        h = jax.nn.relu(_ref_conv1d(h, w2, b2) * m)
        o = _ref_conv1d(h, w3, b3) * m
        outs.append(jax.nn.relu(o * scales[l]))
    return tuple(outs)


if __name__ == "__main__":
    B = 2
    input_dim = 32
    feat_dim = 32
    num_classes = 4          # unused: class_aware=False -> offset head emits 2
    fpn_levels = 2
    K = 3                    # kernel_size
    Ts = [20, 10]            # ragged FPN level lengths (exercise tail padding)

    key = jax.random.PRNGKey(0)
    keys = jax.random.split(key, 16)
    w1 = jax.random.normal(keys[0], (K, input_dim, feat_dim), jnp.float32) * 0.1
    b1 = jax.random.normal(keys[1], (1, feat_dim), jnp.float32) * 0.1
    w2 = jax.random.normal(keys[2], (K, feat_dim, feat_dim), jnp.float32) * 0.1
    b2 = jax.random.normal(keys[3], (1, feat_dim), jnp.float32) * 0.1
    w3 = jax.random.normal(keys[4], (K, feat_dim, 2), jnp.float32) * 0.1
    b3 = jax.random.normal(keys[5], (1, 2), jnp.float32) * 0.1
    params = (w1, b1, w2, b2, w3, b3)
    # Scale() modules initialize their learnable scalar to 1.0
    scales = [jnp.float32(1.0) for _ in range(fpn_levels)]

    fpn_feats, fpn_masks = [], []
    for l, T in enumerate(Ts):
        fpn_feats.append(
            jax.random.normal(keys[6 + l], (B, T, input_dim), jnp.float32))
        valid_len = jnp.array([T, max(T // 2, 1)], jnp.int32)   # per-batch lengths
        t_idx = jnp.arange(T)[None, :, None]
        fpn_masks.append((t_idx < valid_len[:, None, None]).astype(jnp.float32))

    refs = ref_forward(fpn_feats, fpn_masks, params, scales)

    # Run once with one tile per level (default) and once with tiny tiles to
    # exercise the cross-tile halo exchange; both must match the reference.
    for tile in (512, 16):
        outs = ccnet_reghead_forward(fpn_feats, fpn_masks, params, scales,
                                     max_time_tile=tile)
        outs = jax.block_until_ready(outs)
        for o, r in zip(outs, refs):
            assert o.shape == r.shape, (o.shape, r.shape)
            err = float(jnp.max(jnp.abs(o - r)))
            assert err < 5e-3, (tile, err)

    print("KERNEL_OK")
</pallas_src>

<mosaic_0001>
module attributes {stable_mosaic.version = 11 : i64} {
  func.func @reghead_tile_kernel(%arg0: i32, %arg1: memref<2x32x32xbf16, #tpu.memory_space<vmem>>, %arg2: memref<2x16x32xbf16, #tpu.memory_space<vmem>>, %arg3: memref<2x16x32xbf16, #tpu.memory_space<vmem>>, %arg4: memref<2x32x1xf32, #tpu.memory_space<vmem>>, %arg5: memref<2x16x1xf32, #tpu.memory_space<vmem>>, %arg6: memref<2x16x1xf32, #tpu.memory_space<vmem>>, %arg7: memref<96x32xbf16, #tpu.memory_space<vmem>>, %arg8: memref<1x32xf32, #tpu.memory_space<vmem>>, %arg9: memref<96x32xbf16, #tpu.memory_space<vmem>>, %arg10: memref<1x32xf32, #tpu.memory_space<vmem>>, %arg11: memref<96x2xbf16, #tpu.memory_space<vmem>>, %arg12: memref<1x2xf32, #tpu.memory_space<vmem>>, %arg13: memref<1xf32, #tpu.memory_space<smem>>, %arg14: memref<2x32x2xf32, #tpu.memory_space<vmem>>) attributes {dimension_semantics = [#tpu.dimension_semantics<parallel>], iteration_bounds = array<i64: 1>, scalar_prefetch = 0 : i64, scratch_operands = 0 : i64, tpu.core_type = #tpu.core_type<tc>, window_params = [{transform_indices = @transform_0, window_bounds = array<i64: 2, 32, 32>}, {transform_indices = @transform_1, window_bounds = array<i64: 2, 16, 32>}, {transform_indices = @transform_2, window_bounds = array<i64: 2, 16, 32>}, {transform_indices = @transform_3, window_bounds = array<i64: 2, 32, 1>}, {transform_indices = @transform_4, window_bounds = array<i64: 2, 16, 1>}, {transform_indices = @transform_5, window_bounds = array<i64: 2, 16, 1>}, {pipeline_mode = #tpu.pipeline_mode<synchronous>, transform_indices = @transform_6, window_bounds = array<i64: 96, 32>}, {pipeline_mode = #tpu.pipeline_mode<synchronous>, transform_indices = @transform_7, window_bounds = array<i64: 1, 32>}, {pipeline_mode = #tpu.pipeline_mode<synchronous>, transform_indices = @transform_8, window_bounds = array<i64: 96, 32>}, {pipeline_mode = #tpu.pipeline_mode<synchronous>, transform_indices = @transform_9, window_bounds = array<i64: 1, 32>}, {pipeline_mode = #tpu.pipeline_mode<synchronous>, transform_indices = @transform_10, window_bounds = array<i64: 96, 2>}, {pipeline_mode = #tpu.pipeline_mode<synchronous>, transform_indices = @transform_11, window_bounds = array<i64: 1, 2>}, {transform_indices = @transform_12, window_bounds = array<i64: 1>}, {transform_indices = @transform_13, window_bounds = array<i64: 2, 32, 2>}]} {
    %c0 = arith.constant 0 : index
    %0 = memref.load %arg13[%c0] : memref<1xf32, #tpu.memory_space<smem>>
    %c0_0 = arith.constant 0 : index
    %c0_1 = arith.constant 0 : index
    %c0_2 = arith.constant 0 : index
    %1 = vector.load %arg2[%c0_0, %c0_1, %c0_2] : memref<2x16x32xbf16, #tpu.memory_space<vmem>>, vector<2x16x32xbf16>
    %c0_3 = arith.constant 0 : index
    %c0_4 = arith.constant 0 : index
    %c0_5 = arith.constant 0 : index
    %2 = vector.load %arg3[%c0_3, %c0_4, %c0_5] : memref<2x16x32xbf16, #tpu.memory_space<vmem>>, vector<2x16x32xbf16>
    %c0_6 = arith.constant 0 : index
    %c0_7 = arith.constant 0 : index
    %c0_8 = arith.constant 0 : index
    %3 = vector.load %arg5[%c0_6, %c0_7, %c0_8] : memref<2x16x1xf32, #tpu.memory_space<vmem>>, vector<2x16x1xf32>
    %c0_9 = arith.constant 0 : index
    %c0_10 = arith.constant 0 : index
    %c0_11 = arith.constant 0 : index
    %4 = vector.load %arg6[%c0_9, %c0_10, %c0_11] : memref<2x16x1xf32, #tpu.memory_space<vmem>>, vector<2x16x1xf32>
    %c0_i32 = arith.constant 0 : i32
    %5 = arith.cmpi sgt, %arg0, %c0_i32 : i32
    %cst = arith.constant 0.000000e+00 : bf16
    %6 = vector.broadcast %cst : bf16 to vector<2x16x32xbf16>
    %7 = arith.select %5, %1, %6 : vector<2x16x32xbf16>
    %c0_i32_12 = arith.constant 0 : i32
    %8 = arith.cmpi sgt, %arg0, %c0_i32_12 : i32
    %cst_13 = arith.constant 0.000000e+00 : f32
    %9 = vector.broadcast %cst_13 : f32 to vector<2x16x1xf32>
    %10 = arith.select %8, %3, %9 : vector<2x16x1xf32>
    %c0_i32_14 = arith.constant 0 : i32
    %11 = arith.cmpi slt, %arg0, %c0_i32_14 : i32
    %cst_15 = arith.constant 0.000000e+00 : bf16
    %12 = vector.broadcast %cst_15 : bf16 to vector<2x16x32xbf16>
    %13 = arith.select %11, %2, %12 : vector<2x16x32xbf16>
    %c0_i32_16 = arith.constant 0 : i32
    %14 = arith.cmpi slt, %arg0, %c0_i32_16 : i32
    %cst_17 = arith.constant 0.000000e+00 : f32
    %15 = vector.broadcast %cst_17 : f32 to vector<2x16x1xf32>
    %16 = arith.select %14, %4, %15 : vector<2x16x1xf32>
    %c0_18 = arith.constant 0 : index
    %c0_19 = arith.constant 0 : index
    %c0_20 = arith.constant 0 : index
    %17 = vector.load %arg1[%c0_18, %c0_19, %c0_20] : memref<2x32x32xbf16, #tpu.memory_space<vmem>>, vector<2x32x32xbf16>
    %18 = tpu.concatenate %7, %17, %13 in 1 : vector<2x16x32xbf16>, vector<2x32x32xbf16>, vector<2x16x32xbf16> -> vector<2x64x32xbf16>
    %c0_21 = arith.constant 0 : index
    %c0_22 = arith.constant 0 : index
    %c0_23 = arith.constant 0 : index
    %19 = vector.load %arg4[%c0_21, %c0_22, %c0_23] : memref<2x32x1xf32, #tpu.memory_space<vmem>>, vector<2x32x1xf32>
    %20 = tpu.concatenate %10, %19, %16 in 1 : vector<2x16x1xf32>, vector<2x32x1xf32>, vector<2x16x1xf32> -> vector<2x64x1xf32>
    %21 = vector.extract_strided_slice %20 {offsets = [0, 8, 0], sizes = [2, 48, 1], strides = [1, 1, 1]} : vector<2x64x1xf32> to vector<2x48x1xf32>
    %22 = vector.extract_strided_slice %18 {offsets = [0, 7, 0], sizes = [2, 48, 32], strides = [1, 1, 1]} : vector<2x64x32xbf16> to vector<2x48x32xbf16>
    %23 = vector.extract_strided_slice %18 {offsets = [0, 8, 0], sizes = [2, 48, 32], strides = [1, 1, 1]} : vector<2x64x32xbf16> to vector<2x48x32xbf16>
    %24 = vector.extract_strided_slice %18 {offsets = [0, 9, 0], sizes = [2, 48, 32], strides = [1, 1, 1]} : vector<2x64x32xbf16> to vector<2x48x32xbf16>
    %25 = tpu.concatenate %22, %23, %24 in 2 : vector<2x48x32xbf16>, vector<2x48x32xbf16>, vector<2x48x32xbf16> -> vector<2x48x96xbf16>
    %26 = vector.shape_cast %25 : vector<2x48x96xbf16> to vector<96x96xbf16>
    %c0_24 = arith.constant 0 : index
    %c0_25 = arith.constant 0 : index
    %27 = vector.load %arg7[%c0_24, %c0_25] : memref<96x32xbf16, #tpu.memory_space<vmem>>, vector<96x32xbf16>
    %cst_26 = arith.constant dense<0.000000e+00> : vector<96x32xf32>
    %28 = tpu.matmul %26, %27, %cst_26 {dimension_numbers = #tpu.dot_dimension_numbers<[1], [0], [0], [1], [0, 0, 1, 1], [], []>} : vector<96x96xbf16>, vector<96x32xbf16>, vector<96x32xf32> -> vector<96x32xf32>
    %c0_27 = arith.constant 0 : index
    %c0_28 = arith.constant 0 : index
    %29 = vector.load %arg8[%c0_27, %c0_28] : memref<1x32xf32, #tpu.memory_space<vmem>>, vector<1x32xf32>
    %30 = vector.broadcast %29 : vector<1x32xf32> to vector<96x32xf32>
    %31 = arith.addf %28, %30 : vector<96x32xf32>
    %32 = vector.shape_cast %31 : vector<96x32xf32> to vector<2x48x32xf32>
    %33 = vector.broadcast %21 : vector<2x48x1xf32> to vector<2x48x32xf32>
    %34 = arith.mulf %32, %33 : vector<2x48x32xf32>
    %cst_29 = arith.constant 0.000000e+00 : f32
    %35 = vector.broadcast %cst_29 : f32 to vector<2x48x32xf32>
    %36 = arith.maximumf %34, %35 : vector<2x48x32xf32>
    %37 = arith.truncf %36 : vector<2x48x32xf32> to vector<2x48x32xbf16>
    %38 = vector.extract_strided_slice %20 {offsets = [0, 12, 0], sizes = [2, 40, 1], strides = [1, 1, 1]} : vector<2x64x1xf32> to vector<2x40x1xf32>
    %39 = vector.extract_strided_slice %37 {offsets = [0, 3, 0], sizes = [2, 40, 32], strides = [1, 1, 1]} : vector<2x48x32xbf16> to vector<2x40x32xbf16>
    %40 = vector.extract_strided_slice %37 {offsets = [0, 4, 0], sizes = [2, 40, 32], strides = [1, 1, 1]} : vector<2x48x32xbf16> to vector<2x40x32xbf16>
    %41 = vector.extract_strided_slice %37 {offsets = [0, 5, 0], sizes = [2, 40, 32], strides = [1, 1, 1]} : vector<2x48x32xbf16> to vector<2x40x32xbf16>
    %42 = tpu.concatenate %39, %40, %41 in 2 : vector<2x40x32xbf16>, vector<2x40x32xbf16>, vector<2x40x32xbf16> -> vector<2x40x96xbf16>
    %43 = vector.shape_cast %42 : vector<2x40x96xbf16> to vector<80x96xbf16>
    %c0_30 = arith.constant 0 : index
    %c0_31 = arith.constant 0 : index
    %44 = vector.load %arg9[%c0_30, %c0_31] : memref<96x32xbf16, #tpu.memory_space<vmem>>, vector<96x32xbf16>
    %cst_32 = arith.constant dense<0.000000e+00> : vector<80x32xf32>
    %45 = tpu.matmul %43, %44, %cst_32 {dimension_numbers = #tpu.dot_dimension_numbers<[1], [0], [0], [1], [0, 0, 1, 1], [], []>} : vector<80x96xbf16>, vector<96x32xbf16>, vector<80x32xf32> -> vector<80x32xf32>
    %c0_33 = arith.constant 0 : index
    %c0_34 = arith.constant 0 : index
    %46 = vector.load %arg10[%c0_33, %c0_34] : memref<1x32xf32, #tpu.memory_space<vmem>>, vector<1x32xf32>
    %47 = vector.broadcast %46 : vector<1x32xf32> to vector<80x32xf32>
    %48 = arith.addf %45, %47 : vector<80x32xf32>
    %49 = vector.shape_cast %48 : vector<80x32xf32> to vector<2x40x32xf32>
    %50 = vector.broadcast %38 : vector<2x40x1xf32> to vector<2x40x32xf32>
    %51 = arith.mulf %49, %50 : vector<2x40x32xf32>
    %cst_35 = arith.constant 0.000000e+00 : f32
    %52 = vector.broadcast %cst_35 : f32 to vector<2x40x32xf32>
    %53 = arith.maximumf %51, %52 : vector<2x40x32xf32>
    %54 = arith.truncf %53 : vector<2x40x32xf32> to vector<2x40x32xbf16>
    %55 = vector.extract_strided_slice %20 {offsets = [0, 16, 0], sizes = [2, 32, 1], strides = [1, 1, 1]} : vector<2x64x1xf32> to vector<2x32x1xf32>
    %56 = vector.extract_strided_slice %54 {offsets = [0, 3, 0], sizes = [2, 32, 32], strides = [1, 1, 1]} : vector<2x40x32xbf16> to vector<2x32x32xbf16>
    %57 = vector.extract_strided_slice %54 {offsets = [0, 4, 0], sizes = [2, 32, 32], strides = [1, 1, 1]} : vector<2x40x32xbf16> to vector<2x32x32xbf16>
    %58 = vector.extract_strided_slice %54 {offsets = [0, 5, 0], sizes = [2, 32, 32], strides = [1, 1, 1]} : vector<2x40x32xbf16> to vector<2x32x32xbf16>
    %59 = tpu.concatenate %56, %57, %58 in 2 : vector<2x32x32xbf16>, vector<2x32x32xbf16>, vector<2x32x32xbf16> -> vector<2x32x96xbf16>
    %60 = vector.shape_cast %59 : vector<2x32x96xbf16> to vector<64x96xbf16>
    %c0_36 = arith.constant 0 : index
    %c0_37 = arith.constant 0 : index
    %61 = vector.load %arg11[%c0_36, %c0_37] : memref<96x2xbf16, #tpu.memory_space<vmem>>, vector<96x2xbf16>
    %cst_38 = arith.constant dense<0.000000e+00> : vector<64x2xf32>
    %62 = tpu.matmul %60, %61, %cst_38 {dimension_numbers = #tpu.dot_dimension_numbers<[1], [0], [0], [1], [0, 0, 1, 1], [], []>} : vector<64x96xbf16>, vector<96x2xbf16>, vector<64x2xf32> -> vector<64x2xf32>
    %c0_39 = arith.constant 0 : index
    %c0_40 = arith.constant 0 : index
    %63 = vector.load %arg12[%c0_39, %c0_40] : memref<1x2xf32, #tpu.memory_space<vmem>>, vector<1x2xf32>
    %64 = vector.broadcast %63 : vector<1x2xf32> to vector<64x2xf32>
    %65 = arith.addf %62, %64 : vector<64x2xf32>
    %66 = vector.shape_cast %65 : vector<64x2xf32> to vector<2x32x2xf32>
    %67 = vector.broadcast %55 : vector<2x32x1xf32> to vector<2x32x2xf32>
    %68 = arith.mulf %66, %67 : vector<2x32x2xf32>
    %69 = vector.broadcast %0 : f32 to vector<2x32x2xf32>
    %70 = arith.mulf %68, %69 : vector<2x32x2xf32>
    %cst_41 = arith.constant 0.000000e+00 : f32
    %71 = vector.broadcast %cst_41 : f32 to vector<2x32x2xf32>
    %72 = arith.maximumf %70, %71 : vector<2x32x2xf32>
    %c0_42 = arith.constant 0 : index
    %c0_43 = arith.constant 0 : index
    %c0_44 = arith.constant 0 : index
    %73 = vector.load %arg14[%c0_42, %c0_43, %c0_44] : memref<2x32x2xf32, #tpu.memory_space<vmem>>, vector<2x32x2xf32>
    tpu.vector_store %arg14[%c0_42, %c0_43, %c0_44], %72 {strides = array<i32>} : memref<2x32x2xf32, #tpu.memory_space<vmem>>, vector<2x32x2xf32>,
    return
  }
  func.func @transform_0(%arg0: i32) -> (i32, i32, i32) {
    %c0_i32 = arith.constant 0 : i32
    %c0_i32_0 = arith.constant 0 : i32
    %c0_i32_1 = arith.constant 0 : i32
    return %c0_i32, %arg0, %c0_i32_0 : i32, i32, i32
  }
  func.func @transform_1(%arg0: i32) -> (i32, i32, i32) {
    %c2_i32 = arith.constant 2 : i32
    %0 = arith.muli %arg0, %c2_i32 : i32
    %c1_i32 = arith.constant 1 : i32
    %1 = arith.subi %0, %c1_i32 : i32
    %c0_i32 = arith.constant 0 : i32
    %2 = arith.maxsi %1, %c0_i32 : i32
    %c0_i32_0 = arith.constant 0 : i32
    %c0_i32_1 = arith.constant 0 : i32
    %c0_i32_2 = arith.constant 0 : i32
    return %c0_i32_0, %2, %c0_i32_1 : i32, i32, i32
  }
  func.func @transform_2(%arg0: i32) -> (i32, i32, i32) {
    %c1_i32 = arith.constant 1 : i32
    %0 = arith.addi %arg0, %c1_i32 : i32
    %c2_i32 = arith.constant 2 : i32
    %1 = arith.muli %0, %c2_i32 : i32
    %c1_i32_0 = arith.constant 1 : i32
    %2 = arith.minsi %1, %c1_i32_0 : i32
    %c0_i32 = arith.constant 0 : i32
    %c0_i32_1 = arith.constant 0 : i32
    %c0_i32_2 = arith.constant 0 : i32
    return %c0_i32, %2, %c0_i32_1 : i32, i32, i32
  }
  func.func @transform_3(%arg0: i32) -> (i32, i32, i32) {
    %c0_i32 = arith.constant 0 : i32
    %c0_i32_0 = arith.constant 0 : i32
    %c0_i32_1 = arith.constant 0 : i32
    return %c0_i32, %arg0, %c0_i32_0 : i32, i32, i32
  }
  func.func @transform_4(%arg0: i32) -> (i32, i32, i32) {
    %c2_i32 = arith.constant 2 : i32
    %0 = arith.muli %arg0, %c2_i32 : i32
    %c1_i32 = arith.constant 1 : i32
    %1 = arith.subi %0, %c1_i32 : i32
    %c0_i32 = arith.constant 0 : i32
    %2 = arith.maxsi %1, %c0_i32 : i32
    %c0_i32_0 = arith.constant 0 : i32
    %c0_i32_1 = arith.constant 0 : i32
    %c0_i32_2 = arith.constant 0 : i32
    return %c0_i32_0, %2, %c0_i32_1 : i32, i32, i32
  }
  func.func @transform_5(%arg0: i32) -> (i32, i32, i32) {
    %c1_i32 = arith.constant 1 : i32
    %0 = arith.addi %arg0, %c1_i32 : i32
    %c2_i32 = arith.constant 2 : i32
    %1 = arith.muli %0, %c2_i32 : i32
    %c1_i32_0 = arith.constant 1 : i32
    %2 = arith.minsi %1, %c1_i32_0 : i32
    %c0_i32 = arith.constant 0 : i32
    %c0_i32_1 = arith.constant 0 : i32
    %c0_i32_2 = arith.constant 0 : i32
    return %c0_i32, %2, %c0_i32_1 : i32, i32, i32
  }
  func.func @transform_6(%arg0: i32) -> (i32, i32) {
    %c0_i32 = arith.constant 0 : i32
    %c0_i32_0 = arith.constant 0 : i32
    %c0_i32_1 = arith.constant 0 : i32
    return %c0_i32, %c0_i32_0 : i32, i32
  }
  func.func @transform_7(%arg0: i32) -> (i32, i32) {
    %c0_i32 = arith.constant 0 : i32
    %c0_i32_0 = arith.constant 0 : i32
    %c0_i32_1 = arith.constant 0 : i32
    return %c0_i32, %c0_i32_0 : i32, i32
  }
  func.func @transform_8(%arg0: i32) -> (i32, i32) {
    %c0_i32 = arith.constant 0 : i32
    %c0_i32_0 = arith.constant 0 : i32
    %c0_i32_1 = arith.constant 0 : i32
    return %c0_i32, %c0_i32_0 : i32, i32
  }
  func.func @transform_9(%arg0: i32) -> (i32, i32) {
    %c0_i32 = arith.constant 0 : i32
    %c0_i32_0 = arith.constant 0 : i32
    %c0_i32_1 = arith.constant 0 : i32
    return %c0_i32, %c0_i32_0 : i32, i32
  }
  func.func @transform_10(%arg0: i32) -> (i32, i32) {
    %c0_i32 = arith.constant 0 : i32
    %c0_i32_0 = arith.constant 0 : i32
    %c0_i32_1 = arith.constant 0 : i32
    return %c0_i32, %c0_i32_0 : i32, i32
  }
  func.func @transform_11(%arg0: i32) -> (i32, i32) {
    %c0_i32 = arith.constant 0 : i32
    %c0_i32_0 = arith.constant 0 : i32
    %c0_i32_1 = arith.constant 0 : i32
    return %c0_i32, %c0_i32_0 : i32, i32
  }
  func.func @transform_12(%arg0: i32) -> i32 {
    %c0_i32 = arith.constant 0 : i32
    %c0_i32_0 = arith.constant 0 : i32
    return %c0_i32 : i32
  }
  func.func @transform_13(%arg0: i32) -> (i32, i32, i32) {
    %c0_i32 = arith.constant 0 : i32
    %c0_i32_0 = arith.constant 0 : i32
    %c0_i32_1 = arith.constant 0 : i32
    return %c0_i32, %arg0, %c0_i32_0 : i32, i32, i32
  }
}

</mosaic_0001>

<bundles_post_ra>
// kernel: tpu_custom_call.1
= control target key start
LH: loop header
LB: loop body
LE: loop exit
PB: predicated region body
PF: predicated region fallthrough
CT: control target
= control target key end

     0   :  { %vm460_vm0 = vcmask 1046528   ;;  %v1867_v4 = vmov 0   ;;  %s1868_s27 = smov 64   ;;  %vm381_vm1 = vsmask.f32 7424  ;;  %v1870_v49 = vmov 0.0   ;;  %s2458_s0 = inlined_call_operand.vmem [shape: bf16[2,32,32], index: 0, kind: input, shape index: {}]   ;;  %s2459_s1 = inlined_call_operand.vmem [shape: bf16[2,32,32], index: 1, kind: input, shape index: {}]   ;;  %s2460_s2 = inlined_call_operand.vmem [shape: bf16[2,32,32], index: 2, kind: input, shape index: {}]   ;;  %s2461_s3 = inlined_call_operand.vmem [shape: f32[2,32,1], index: 3, kind: input, shape index: {}]   ;;  %s2462_s4 = inlined_call_operand.vmem [shape: f32[2,32,1], index: 4, kind: input, shape index: {}]   ;;  %s2463_s5 = inlined_call_operand.vmem [shape: f32[2,32,1], index: 5, kind: input, shape index: {}]   ;;  %s2464_s6 = inlined_call_operand.vmem [shape: bf16[96,32], index: 6, kind: input, shape index: {}]   ;;  %s2465_s7 = inlined_call_operand.vmem [shape: f32[1,32], index: 7, kind: input, shape index: {}]   ;;  %s2466_s8 = inlined_call_operand.vmem [shape: bf16[96,32], index: 8, kind: input, shape index: {}]   ;;  %s2467_s9 = inlined_call_operand.vmem [shape: f32[1,32], index: 9, kind: input, shape index: {}]   ;;  %s2468_s10 = inlined_call_operand.vmem [shape: bf16[96,2], index: 10, kind: input, shape index: {}]   ;;  %s2469_s11 = inlined_call_operand.vmem [shape: f32[1,2], index: 11, kind: input, shape index: {}]   ;;  %s2470_s12 = inlined_call_operand.<no memory space> [shape: f32[1], index: 12, kind: input, shape index: {}]   ;;  %s2471_s13 = inlined_call_operand.vmem [shape: f32[2,32,2], index: 13, kind: output, shape index: {}]  }
   0x1   :  { %v1945_v0 = vld [vmem:[%s2458_s0] sm:$0xff]   ;;  %v1950_v1 = vld [vmem:[%s2458_s0 + $0x8] sm:$0xff]   ;;  %v1954_v5 = vcombine.low %v1867_v4, %v1867_v4  ;;  %1844 = vset.pattern.permute.xlu1 %v1867_v4  ;;  %1843 = vset.pattern.permute.xlu0 %v1867_v4  ;;  %v1963_v10 = vld [vmem:[%s2458_s0 + $0x10] sm:$0xff]   ;;  %vm491_vm2 = vcmask 261120   ;;  %vm508_vm3 = vcmask 523264   ;;  %vm643_vm5 = vcmask 785408  }
   0x2   :  { %v462_v2 = vrot.slane %v1945_v0, 1  ;;  %v464_v3 = vrot.slane %v1950_v1, 1  ;;  %v390_v6 = vshll.u32 %v1945_v0, 16  ;;  %v398_v7 = vshll.u32 %v1950_v1, 16  ;;  %v1849_v19 = vld [vmem:[%s2464_s6] sm:$0xff]   ;;  %v1982_v21 = vld [vmem:[%s2458_s0 + $0x18] sm:$0xff]   ;;  %1786 = vmatprep.subr.bf16.mxu1 %v1870_v49 }
   0x3   :  { %v402_v8 = vshrl.u32 %v1950_v1, 16  ;;  %v394_v9 = vshrl.u32 %v1945_v0, 16  ;;  %v1967_v12 = vrot.slane %v1954_v5, 1  ;;  %v383_v13 = vshrl.u32 %v1954_v5, 16  ;;  %1762 = vmatprep.subr.bf16.mxu0 %v1849_v19  ;;  %v1850_v26 = vld [vmem:[%s2464_s6 + $0x8] sm:$0xff]   ;;  %v1851_v28 = vld [vmem:[%s2464_s6 + $0x10] sm:$0xff]  }
   0x4   :  { %v465_v11 = vsel %vm460_vm0, %v462_v2, %v464_v3  ;;  %v385_v14 = vshll.u32 %v1954_v5, 16  ;;  %v400_v15 = vrot.slane %v398_v7, 1  ;;  %v392_v18 = vrot.slane %v390_v6, 1  ;;  %1763 = vmatpush3.bf16.msra.mxu0 %v1849_v19  ;;  %s1869_s0 = smov 32   ;;  %v1852_v34 = vld [vmem:[%s2464_s6 + $0x18] sm:$0xff]   ;;  %v1853_v39 = vld [vmem:[%s2464_s6 + $0x20] sm:$0xff]  }
   0x5   :  { %477 = vrot.lane.b32.xlu0 %v465_v11, %s1868_s27  ;;  %v463_v16 = vsel %vm460_vm0, %v1967_v12, %v462_v2  ;;  %v421_v20 = vshll.u32 %v1963_v10, 16  ;;  %v467_v22 = vsel %vm460_vm0, %v464_v3, %v1967_v12  ;;  %1764 = vmatprep.subr.bf16.mxu0 %v1850_v26  ;;  %v429_v29 = vshll.u32 %v1982_v21, 16  ;;  %v1854_v43 = vld [vmem:[%s2464_s6 + $0x28] sm:$0xff]   ;;  %v373_v50 = vld [vmem:[%s2461_s3] sm:$0xff]  ;;  %v375_v52 = vld [vmem:[%s2461_s3 + $0x10] sm:$0xff] }
   0x6   :  { %v387_v17 = vrot.slane %v385_v14, 1  ;;  %475 = vrot.lane.b32.xlu1 %v463_v16, %s1868_s27  ;;  %v404_v24 = vor.u32 %v402_v8, %v400_v15  ;;  %v396_v25 = vor.u32 %v394_v9, %v392_v18  ;;  %v425_v33 = vshrl.u32 %v1963_v10, 16  ;;  %v374_v51 = vld [vmem:[%s2461_s3 + $0x8] sm:$0xff]  ;;  %v376_v53 = vld [vmem:[%s2461_s3 + $0x18] sm:$0xff]  ;;  %v377_v54 = vld [vmem:[%s2461_s3 + $0x20] sm:$0xff] }
   0x7   :  { %v423_v32 = vrot.slane %v421_v20, 1  ;;  %v431_v35 = vrot.slane %v429_v29, 1  ;;  %v469_v36 = vrot.slane %v1963_v10, 1  ;;  %v471_v40 = vrot.slane %v1982_v21, 1  ;;  %v378_v55 = vld [vmem:[%s2461_s3 + $0x28] sm:$0xff]  ;;  %v379_v56 = vld [vmem:[%s2461_s3 + $0x30] sm:$0xff] }
   0x8   :  { %v388_v23 = vor.u32 %v387_v17, %v383_v13  ;;  %v409_v30 = vsel %vm381_vm1, %v404_v24, %v387_v17  ;;  %v401_v31 = vsel %vm381_vm1, %v396_v25, %v400_v15  ;;  %1765 = vmatpush3.bf16.msra.mxu0 %v1850_v26  ;;  %v433_v41 = vshrl.u32 %v1982_v21, 16  ;;  %v380_v57 = vld [vmem:[%s2461_s3 + $0x38] sm:$0xff] }
   0x9   :  { %1766 = vmatprep.subr.bf16.mxu0 %v1851_v28  ;;  %v427_v38 = vor.u32 %v425_v33, %v423_v32  ;;  %v472_v44 = vsel %vm460_vm0, %v469_v36, %v471_v40  ;;  %v470_v45 = vsel %vm460_vm0, %v1967_v12, %v469_v36  ;;  %v474_v48 = vsel %vm460_vm0, %v471_v40, %v1967_v12 }
   0xa   :  { %v393_v27 = vsel %vm381_vm1, %v388_v23, %v392_v18  ;;  %479 = vrot.lane.b32.xlu1 %v467_v22, %s1868_s27  ;;  %v424_v37 = vsel %vm381_vm1, %v388_v23, %v423_v32  ;;  %v435_v46 = vor.u32 %v433_v41, %v431_v35  ;;  %vm525_vm4 = vsmask.f32 4352 }
   0xb   :  { %444 = vrot.lane.b32.xlu0 %v393_v27, %s1869_s0  ;;  %v432_v42 = vsel %vm381_vm1, %v427_v38, %v431_v35  ;;  %vm1871_vm6 = vmmov 0   ;;  %vm973_vm7 = vsmask.f32 2304  ;;  %vm974_vm8 = vsmask.f32 6416 }
   0xc   :  { %1767 = vmatpush3.bf16.msra.mxu0 %v1851_v28  ;;  %v440_v47 = vsel %vm381_vm1, %v435_v46, %v387_v17  ;;  %1798 = vmatprep.mubr.msk.bf16.mxu1 %vm1871_vm6, %v1870_v49  ;;  %vm2237_vm9 = vmor %vm973_vm7, %vm974_vm8  ;;  %vm1250_vm10 = vcmask 1043456   ;;  %vm1419_vm11 = vsmask.f32 6400  ;;  %vm1623_vm12 = vcmask 15360  }
   0xd   :  { %1768 = vmatprep.subr.bf16.mxu0 %v1852_v34 }
   0xe   :  { %448 = vrot.lane.b32.xlu1 %v409_v30, %s1869_s0 }
   0xf   :  { %446 = vrot.lane.b32.xlu0 %v401_v31, %s1869_s0 }
  0x10   :  { %1769 = vmatpush3.bf16.msra.mxu0 %v1852_v34 }
  0x11   :  { %1770 = vmatprep.subr.bf16.mxu0 %v1853_v39 }
  0x12   :  { %452 = vrot.lane.b32.xlu1 %v424_v37, %s1869_s0 }
  0x13   :  { %450 = vrot.lane.b32.xlu0 %v388_v23, %s1869_s0 }
  0x14   :  { %1771 = vmatpush3.bf16.msra.mxu0 %v1853_v39 }
  0x15   :  { %1772 = vmatprep.subr.bf16.mxu0 %v1854_v43 }
  0x16   :  { %481 = vrot.lane.b32.xlu1 %v1967_v12, %s1868_s27 }
  0x17   :  { %454 = vrot.lane.b32.xlu0 %v432_v42, %s1869_s0 }
  0x18   :  { %1773 = vmatpush3.bf16.msra.mxu0 %v1854_v43 }
  0x1a   :  { %485 = vrot.lane.b32.xlu1 %v472_v44, %s1868_s27 }
  0x1b   :  { %483 = vrot.lane.b32.xlu0 %v470_v45, %s1868_s27 }
  0x1e   :  { %458 = vrot.lane.b32.xlu1 %v388_v23, %s1869_s0 }
  0x1f   :  { %456 = vrot.lane.b32.xlu0 %v440_v47, %s1869_s0 }
  0x22   :  { %489 = vrot.lane.b32.xlu1 %v1967_v12, %s1868_s27 }
  0x23   :  { %487 = vrot.lane.b32.xlu0 %v474_v48, %s1868_s27 }
  0x26   :  { %750 = vperm.xlu1 %1844, %v373_v50  }
  0x27   :  { %745 = vperm.xlu0 %1843, %v1870_v49  }
  0x2a   :  { %755 = vperm.xlu1 %1844, %v374_v51  }
  0x2b   :  { %760 = vperm.xlu0 %1843, %v375_v52  }
  0x2e   :  { %765 = vperm.xlu1 %1844, %v376_v53  }
  0x2f   :  { %770 = vperm.xlu0 %1843, %v1870_v49  }
  0x32   :  { %775 = vperm.xlu1 %1844, %v1870_v49  }
  0x33   :  { %780 = vperm.xlu0 %1843, %v377_v54  }
  0x36   :  { %785 = vperm.xlu1 %1844, %v378_v55  }
  0x37   :  { %790 = vperm.xlu0 %1843, %v379_v56  }
  0x3a   :  { %795 = vperm.xlu1 %1844, %v380_v57  }
  0x3b   :  { %800 = vperm.xlu0 %1843, %v1870_v49  }
  0x77   :  { %v478_v58 = vpop.permute.xlu0 %477 }
  0x78   :  { %v476_v59 = vpop.permute.xlu1 %475 }
  0x7c   :  { %v480_v60 = vpop.permute.xlu1 %479 }
  0x7d   :  { %v445_v61 = vpop.permute.xlu0 %444 }
  0x7e   :  { %v493_v62 = vsel %vm491_vm2, %v1954_v5, %v445_v61 }
  0x7f   :  { %v510_v63 = vsel %vm508_vm3, %v493_v62, %v476_v59 }
  0x80   :  { %v526_v2 = vshrl.u32 %v510_v63, 16  ;;  %v529_v3 = vshll.u32 %v510_v63, 16  ;;  %v449_v4 = vpop.permute.xlu1 %448 }
  0x81   :  { %v447_v6 = vpop.permute.xlu0 %446  ;;  %v497_v7 = vsel %vm491_vm2, %v1950_v1, %v449_v4 }
  0x82   :  { %v495_v8 = vsel %vm491_vm2, %v1945_v0, %v447_v6  ;;  %v528_v9 = vrot.slane %v526_v2, 3  ;;  %v531_v11 = vrot.slane %v529_v3, 4  ;;  %v514_v12 = vsel %vm508_vm3, %v497_v7, %v480_v60 }
  0x83   :  { %v512_v13 = vsel %vm508_vm3, %v495_v8, %v478_v58  ;;  %v541_v14 = vshrl.u32 %v514_v12, 16  ;;  %v544_v15 = vshll.u32 %v514_v12, 16 }
  0x84   :  { %v533_v16 = vshrl.u32 %v512_v13, 16  ;;  %v536_v17 = vshll.u32 %v512_v13, 16  ;;  %v453_v18 = vpop.permute.xlu1 %452  ;;  %v532_v25 = vor.u32 %v531_v11, %v528_v9 }
  0x85   :  { %v451_v19 = vpop.permute.xlu0 %450  ;;  %v543_v20 = vrot.slane %v541_v14, 3  ;;  %v546_v22 = vrot.slane %v544_v15, 4  ;;  %v501_v34 = vsel %vm491_vm2, %v1954_v5, %v453_v18 }
  0x86   :  { %v535_v23 = vrot.slane %v533_v16, 3  ;;  %v538_v24 = vrot.slane %v536_v17, 4  ;;  %v499_v26 = vsel %vm491_vm2, %v1954_v5, %v451_v19  ;;  %v2107_v16 = vld [vmem:[%s2465_s7] ss:$0 sm:$0xff] }
  0x87   :  { %v547_v1 = vor.u32 %v546_v22, %v543_v20  ;;  %v1855_v22 = vld [vmem:[%s2466_s8] sm:$0xff]  }
  0x88   :  { %v539_v0 = vor.u32 %v538_v24, %v535_v23  ;;  %v482_v27 = vpop.permute.xlu1 %481  ;;  %1787 = vmatpush3.bf16.msra.mxu1 %v1855_v22 }
  0x89   :  { %v455_v28 = vpop.permute.xlu0 %454  ;;  %v516_v29 = vsel %vm508_vm3, %v499_v26, %v482_v27  ;;  %1788 = vmatprep.subr.bf16.mxu1 %v1870_v49 }
  0x8a   :  { %v540_v30 = vsel %vm525_vm4, %v532_v25, %v539_v0  ;;  %v548_v31 = vsel %vm525_vm4, %v539_v0, %v547_v1  ;;  %v549_v32 = vshrl.u32 %v516_v29, 16  ;;  %v552_v33 = vshll.u32 %v516_v29, 16 }
  0x8b   :  { %1774 = vmatprep.mubr.msk.bf16.mxu0 %vm643_vm5, %v540_v30  ;;  %v503_v37 = vsel %vm491_vm2, %v1963_v10, %v455_v28 }
  0x8c   :  { %1775 = vmatmul.mubr.msk.bf16.vlgmr.msra.gmra.mrb[0].mxu0 %vm643_vm5, %v548_v31  ;;  %v551_v35 = vrot.slane %v549_v32, 3  ;;  %v554_v36 = vrot.slane %v552_v33, 4  ;;  %v486_v38 = vpop.permute.xlu1 %485 }
  0x8d   :  { %v484_v39 = vpop.permute.xlu0 %483  ;;  %v520_v40 = vsel %vm508_vm3, %v503_v37, %v486_v38  ;;  %v1856_v38 = vld [vmem:[%s2466_s8 + $0x8] sm:$0xff]  }
  0x8e   :  { %v518_v41 = vsel %vm508_vm3, %v501_v34, %v484_v39  ;;  %v555_v42 = vor.u32 %v554_v36, %v551_v35  ;;  %v564_v43 = vshrl.u32 %v520_v40, 16  ;;  %v567_v44 = vshll.u32 %v520_v40, 16  ;;  %1789 = vmatpush3.bf16.msra.mxu1 %v1856_v38 }
  0x8f   :  { %v557_v45 = vshrl.u32 %v518_v41, 16  ;;  %v560_v46 = vshll.u32 %v518_v41, 16  ;;  %1790 = vmatprep.subr.bf16.mxu1 %v1870_v49 }
  0x90   :  { %v566_v47 = vrot.slane %v564_v43, 3  ;;  %v569_v48 = vrot.slane %v567_v44, 4  ;;  %v459_v52 = vpop.permute.xlu1 %458  ;;  %v556_v53 = vsel %vm525_vm4, %v547_v1, %v555_v42 }
  0x91   :  { %v559_v50 = vrot.slane %v557_v45, 3  ;;  %v457_v51 = vpop.permute.xlu0 %456  ;;  %v562_v54 = vrot.slane %v560_v46, 4  ;;  %1778 = vmatprep.mubr.msk.bf16.mxu0 %vm643_vm5, %v556_v53  ;;  %v507_v56 = vsel %vm491_vm2, %v1954_v5, %v459_v52  ;;  %v1857_v52 = vld [vmem:[%s2466_s8 + $0x10] sm:$0xff]  }
  0x92   :  { %v570_v10 = vor.u32 %v569_v48, %v566_v47  ;;  %v505_v55 = vsel %vm491_vm2, %v1982_v21, %v457_v51  ;;  %1791 = vmatpush3.bf16.msra.mxu1 %v1857_v52 }
  0x93   :  { %v563_v57 = vor.u32 %v562_v54, %v559_v50  ;;  %1792 = vmatprep.subr.bf16.mxu1 %v1870_v49 }
  0x94   :  { %v490_v59 = vpop.permute.xlu1 %489 }
  0x95   :  { %v488_v58 = vpop.permute.xlu0 %487  ;;  %v524_v61 = vsel %vm508_vm3, %v507_v56, %v490_v59  ;;  %v571_v62 = vsel %vm525_vm4, %v563_v57, %v570_v10 }
  0x96   :  { %v522_v60 = vsel %vm508_vm3, %v505_v55, %v488_v58  ;;  %v580_v3 = vshrl.u32 %v524_v61, 16  ;;  %v583_v4 = vshll.u32 %v524_v61, 16  ;;  %1779 = vmatmul.mubr.msk.bf16.gmra.mrb[4].mxu0 %vm643_vm5, %v571_v62 }
  0x97   :  { %v572_v63 = vshrl.u32 %v522_v60, 16  ;;  %v575_v2 = vshll.u32 %v522_v60, 16 }
  0x98   :  { %v582_v7 = vrot.slane %v580_v3, 3  ;;  %v585_v8 = vrot.slane %v583_v4, 4  ;;  %v1858_v3 = vld [vmem:[%s2466_s8 + $0x18] sm:$0xff]  }
  0x99   :  { %v574_v6 = vrot.slane %v572_v63, 3  ;;  %v577_v21 = vrot.slane %v575_v2, 4  ;;  %1793 = vmatpush3.bf16.msra.mxu1 %v1858_v3 }
  0x9a   :  { %v586_v9 = vor.u32 %v585_v8, %v582_v7  ;;  %1794 = vmatprep.subr.bf16.mxu1 %v1870_v49 }
  0x9b   :  { %v578_v5 = vor.u32 %v577_v21, %v574_v6 }
  0x9d   :  { %v579_v11 = vsel %vm525_vm4, %v570_v10, %v578_v5  ;;  %v587_v12 = vsel %vm525_vm4, %v578_v5, %v586_v9 }
  0x9e   :  { %1782 = vmatprep.mubr.msk.bf16.mxu0 %vm643_vm5, %v579_v11 }
  0x9f   :  { %1783 = vmatmul.mubr.msk.bf16.gmra.mrb[8].mxu0 %vm643_vm5, %v587_v12 }
  0xa5   :  { %v2098_v13 = vpop.permute.xlu1 %750 }
  0xa6   :  { %v2100_v14 = vpop.permute.xlu0 %745 }
  0xa9   :  { %v2102_v15 = vpop.permute.xlu1 %755 }
  0xaa   :  { %v2109_v17 = vpop.permute.xlu0 %760 }
  0xad   :  { %v2116_v1 = vpop.permute.xlu1 %765 }
  0xae   :  { %v2123_v29 = vpop.permute.xlu0 %770 }
  0xb1   :  { %v2127_v36 = vpop.permute.xlu1 %775 }
  0xb2   :  { %v2136_v40 = vpop.permute.xlu0 %780 }
  0xb5   :  { %v2152_v57 = vpop.permute.xlu1 %785 }
  0xb6   :  { %v2159_v63 = vpop.permute.xlu0 %790 }
 0x15f   :  { %v1776_v18 = vpop.f32.mrb[0].mxu0 }
 0x160   :  { %v705_v19 = vadd.f32 %v1776_v18, %v2107_v16  ;;  %v696_v20 = vpop.f32.mrb[1].mxu0  ;;  %v2171_v18 = vpop.permute.xlu1 %795 }
 0x161   :  { %v697_v23 = vadd.f32 %v2107_v16, %v696_v20  ;;  %v1777_v24 = vpop.f32.mrb[2].mxu0 }
 0x162   :  { %v805_v25 = vmul.f32 %v2102_v15, %v705_v19  ;;  %v708_v0 = vadd.f32 %v1777_v24, %v2107_v16  ;;  %v699_v26 = vpop.f32.mrb[3].mxu0 }
 0x163   :  { %v803_v27 = vmul.f32 %v2100_v14, %v697_v23  ;;  %v700_v28 = vadd.f32 %v2107_v16, %v699_v26  ;;  %v1859_v26 = vld [vmem:[%s2466_s8 + $0x20] sm:$0xff]  }
 0x164   :  { %v806_v30 = vmul.f32 %v2109_v17, %v708_v0  ;;  %v817_v32 = vmax.f32 %v805_v25, 0.0  ;;  %1795 = vmatpush3.bf16.msra.mxu1 %v1859_v26 }
 0x165   :  { %v804_v31 = vmul.f32 %v2098_v13, %v700_v28  ;;  %v815_v34 = vmax.f32 %v803_v27, 0.0  ;;  %v2182_v27 = vpop.permute.xlu0 %800  ;;  %1796 = vmatprep.subr.bf16.mxu1 %v1870_v49 }
 0x166   :  { %v818_v33 = vmax.f32 %v806_v30, 0.0 }
 0x167   :  { %v816_v35 = vmax.f32 %v804_v31, 0.0 }
 0x168   :  { %v2129_v37 = vpack.c.bf16 %v818_v33, %v817_v32 }
 0x169   :  { %v2134_v39 = vpack.c.bf16 %v816_v35, %v815_v34  ;;  %v1780_v41 = vpop.f32.mrb[4].mxu0 }
 0x16a   :  { %v898_v42 = vrot.slane %v2129_v37, 1  ;;  %v721_v43 = vadd.f32 %v1780_v41, %v2107_v16  ;;  %v712_v44 = vpop.f32.mrb[5].mxu0  ;;  %v841_v47 = vshll.u32 %v2129_v37, 16  ;;  %v845_v0 = vshrl.u32 %v2129_v37, 16 }
 0x16b   :  { %v897_v45 = vrot.slane %v2134_v39, 1  ;;  %v836_v46 = vshll.u32 %v2134_v39, 16  ;;  %v713_v48 = vadd.f32 %v2107_v16, %v712_v44  ;;  %v1781_v50 = vpop.f32.mrb[6].mxu0  ;;  %v834_v51 = vshrl.u32 %v2134_v39, 16 }
 0x16c   :  { %v809_v53 = vmul.f32 %v2127_v36, %v721_v43  ;;  %v724_v54 = vadd.f32 %v1781_v50, %v2107_v16  ;;  %v715_v10 = vpop.f32.mrb[7].mxu0  ;;  %v843_v62 = vrot.slane %v841_v47, 1 }
 0x16d   :  { %v899_v55 = vsel %vm460_vm0, %v897_v45, %v898_v42  ;;  %v838_v56 = vrot.slane %v836_v46, 1  ;;  %v807_v58 = vmul.f32 %v2116_v1, %v713_v48  ;;  %v716_v59 = vadd.f32 %v2107_v16, %v715_v10 }
 0x16e   :  { %907 = vrot.lane.b32.xlu0 %v899_v55, %s1868_s27  ;;  %v810_v60 = vmul.f32 %v2136_v40, %v724_v54  ;;  %v821_v4 = vmax.f32 %v809_v53, 0.0  ;;  %v847_v41 = vor.u32 %v845_v0, %v843_v62 }
 0x16f   :  { %v839_v61 = vor.u32 %v838_v56, %v834_v51  ;;  %v808_v2 = vmul.f32 %v2123_v29, %v716_v59  ;;  %v819_v7 = vmax.f32 %v807_v58, 0.0 }
 0x170   :  { %v822_v6 = vmax.f32 %v810_v60, 0.0 }
 0x171   :  { %v844_v21 = vsel %vm381_vm1, %v839_v61, %v843_v62  ;;  %v820_v8 = vmax.f32 %v808_v2, 0.0 }
 0x172   :  { %v1784_v5 = vpop.f32.mrb[8].mxu0  ;;  %879 = vrot.lane.b32.xlu1 %v844_v21, %s1869_s0  ;;  %v2167_v9 = vpack.c.bf16 %v822_v6, %v821_v4 }
 0x173   :  { %v737_v11 = vadd.f32 %v1784_v5, %v2107_v16  ;;  %v728_v12 = vpop.f32.mrb[9].mxu0  ;;  %v2173_v19 = vpack.c.bf16 %v820_v8, %v819_v7 }
 0x174   :  { %v729_v20 = vadd.f32 %v2107_v16, %v728_v12  ;;  %v1785_v22 = vpop.f32.mrb[10].mxu0  ;;  %v859_v34 = vshll.u32 %v2167_v9, 16  ;;  %v857_v54 = vshrl.u32 %v2167_v9, 16  ;;  %v902_v10 = vrot.slane %v2167_v9, 1 }
 0x175   :  { %v813_v23 = vmul.f32 %v2171_v18, %v737_v11  ;;  %v740_v24 = vadd.f32 %v1785_v22, %v2107_v16  ;;  %v731_v25 = vpop.f32.mrb[11].mxu0  ;;  %v900_v31 = vrot.slane %v2173_v19, 1  ;;  %v849_v32 = vshll.u32 %v2173_v19, 16 }
 0x176   :  { %v811_v28 = vmul.f32 %v2152_v57, %v729_v20  ;;  %v732_v30 = vadd.f32 %v2107_v16, %v731_v25  ;;  %v1860_v16 = vld [vmem:[%s2466_s8 + $0x28] sm:$0xff]   ;;  %v861_v51 = vrot.slane %v859_v34, 1 }
 0x177   :  { %v814_v33 = vmul.f32 %v2182_v27, %v740_v24  ;;  %v901_v38 = vsel %vm460_vm0, %v898_v42, %v900_v31  ;;  %v851_v43 = vrot.slane %v849_v32, 1  ;;  %v825_v44 = vmax.f32 %v813_v23, 0.0  ;;  %1797 = vmatpush3.bf16.msra.mxu1 %v1860_v16 }
 0x178   :  { %v812_v35 = vmul.f32 %v2159_v63, %v732_v30  ;;  %909 = vrot.lane.b32.xlu0 %v901_v38, %s1868_s27  ;;  %v823_v46 = vmax.f32 %v811_v28, 0.0  ;;  %v853_v42 = vshrl.u32 %v2173_v19, 16  ;;  %v862_v58 = vor.u32 %v861_v51, %v857_v54 }
 0x179   :  { %v826_v45 = vmax.f32 %v814_v33, 0.0  ;;  %v852_v48 = vsel %vm381_vm1, %v847_v41, %v851_v43 }
 0x17a   :  { %v824_v47 = vmax.f32 %v812_v35, 0.0  ;;  %881 = vrot.lane.b32.xlu1 %v852_v48, %s1869_s0  ;;  %v855_v53 = vor.u32 %v853_v42, %v851_v43 }
 0x17b   :  { %v2198_v50 = vpack.c.bf16 %v826_v45, %v825_v44 }
 0x17c   :  { %v2202_v52 = vpack.c.bf16 %v824_v47, %v823_v46  ;;  %911 = vrot.lane.b32.xlu0 %v900_v31, %s1868_s27 }
 0x17d   :  { %v905_v59 = vrot.slane %v2198_v50, 1  ;;  %v872_v2 = vshll.u32 %v2198_v50, 16  ;;  %v876_v8 = vshrl.u32 %v2198_v50, 16 }
 0x17e   :  { %v903_v55 = vrot.slane %v2202_v52, 1  ;;  %v864_v56 = vshll.u32 %v2202_v52, 16  ;;  %883 = vrot.lane.b32.xlu1 %v855_v53, %s1869_s0  ;;  %v868_v62 = vshrl.u32 %v2202_v52, 16 }
 0x17f   :  { %v874_v21 = vrot.slane %v872_v2, 1  ;;  %v1251_v2 = vrot.slane %v2100_v14, 4 }
 0x180   :  { %v904_v60 = vsel %vm460_vm0, %v902_v10, %v903_v55  ;;  %v866_v61 = vrot.slane %v864_v56, 1  ;;  %v906_v6 = vsel %vm460_vm0, %v903_v55, %v905_v59 }
 0x181   :  { %913 = vrot.lane.b32.xlu0 %v904_v60, %s1868_s27  ;;  %v878_v5 = vor.u32 %v876_v8, %v874_v21 }
 0x182   :  { %v867_v3 = vsel %vm381_vm1, %v862_v58, %v866_v61  ;;  %v870_v4 = vor.u32 %v868_v62, %v866_v61 }
 0x183   :  { %885 = vrot.lane.b32.xlu1 %v867_v3, %s1869_s0 }
 0x184   :  { %v875_v7 = vsel %vm381_vm1, %v870_v4, %v874_v21 }
 0x185   :  { %915 = vrot.lane.b32.xlu0 %v906_v6, %s1868_s27 }
 0x187   :  { %887 = vrot.lane.b32.xlu1 %v875_v7, %s1869_s0 }
 0x189   :  { %917 = vrot.lane.b32.xlu0 %v905_v59, %s1868_s27 }
 0x18b   :  { %889 = vrot.lane.b32.xlu1 %v878_v5, %s1869_s0 }
 0x1e0   :  { %v908_v12 = vpop.permute.xlu0 %907 }
 0x1e4   :  { %v880_v11 = vpop.permute.xlu1 %879 }
 0x1e5   :  { %v920_v20 = vsel %vm491_vm2, %v2134_v39, %v880_v11 }
 0x1e6   :  { %v932_v22 = vsel %vm508_vm3, %v920_v20, %v908_v12 }
 0x1e7   :  { %v1689_v23 = vcombine.low %v932_v22, %v932_v22  ;;  %v1690_v24 = vcombine.high %v932_v22, %v932_v22 }
 0x1e9   :  { %v977_v25 = vshrl.u32 %v1689_v23, 16  ;;  %v980_v0 = vshll.u32 %v1689_v23, 16  ;;  %v986_v26 = vshrl.u32 %v1690_v24, 16  ;;  %v989_v28 = vshll.u32 %v1690_v24, 16 }
 0x1ea   :  { %v910_v30 = vpop.permute.xlu0 %909 }
 0x1eb   :  { %v979_v32 = vrot.slane %v977_v25, 5  ;;  %v982_v33 = vrot.slane %v980_v0, 6  ;;  %v988_v35 = vrot.slane %v986_v26, 5  ;;  %v991_v38 = vrot.slane %v989_v28, 6 }
 0x1ec   :  { %v882_v31 = vpop.permute.xlu1 %881 }
 0x1ed   :  { %v922_v34 = vsel %vm491_vm2, %v2129_v37, %v882_v31  ;;  %v983_v16 = vor.u32 %v982_v33, %v979_v32  ;;  %v992_v48 = vor.u32 %v991_v38, %v988_v35 }
 0x1ee   :  { %v934_v41 = vsel %vm508_vm3, %v922_v34, %v910_v30  ;;  %v912_v44 = vpop.permute.xlu0 %911 }
 0x1ef   :  { %v1691_v39 = vcombine.low %v934_v41, %v934_v41  ;;  %v1692_v43 = vcombine.high %v934_v41, %v934_v41  ;;  %v984_v56 = vrot.slane %v983_v16, 4  ;;  %v994_v61 = vrot.slane %v992_v48, 4 }
 0x1f0   :  { %v884_v45 = vpop.permute.xlu1 %883 }
 0x1f1   :  { %v996_v46 = vshrl.u32 %v1691_v39, 16  ;;  %v999_v47 = vshll.u32 %v1691_v39, 16  ;;  %v924_v42 = vsel %vm491_vm2, %v2173_v19, %v884_v45  ;;  %v1006_v37 = vshrl.u32 %v1692_v43, 16 }
 0x1f2   :  { %v1009_v54 = vshll.u32 %v1692_v43, 16  ;;  %v936_v10 = vsel %vm508_vm3, %v924_v42, %v912_v44 }
 0x1f3   :  { %v998_v51 = vrot.slane %v996_v46, 5  ;;  %v1001_v53 = vrot.slane %v999_v47, 6  ;;  %v1693_v59 = vcombine.low %v936_v10, %v936_v10  ;;  %v914_v60 = vpop.permute.xlu0 %913  ;;  %v1008_v19 = vrot.slane %v1006_v37, 5 }
 0x1f4   :  { %v1011_v3 = vrot.slane %v1009_v54, 6  ;;  %v1694_v28 = vcombine.high %v936_v10, %v936_v10 }
 0x1f5   :  { %v886_v55 = vpop.permute.xlu1 %885  ;;  %v1002_v58 = vor.u32 %v1001_v53, %v998_v51  ;;  %v1016_v4 = vshrl.u32 %v1693_v59, 16  ;;  %v1019_v6 = vshll.u32 %v1693_v59, 16 }
 0x1f6   :  { %v926_v62 = vsel %vm491_vm2, %v2167_v9, %v886_v55  ;;  %v993_v9 = vsel %vm2237_vm9, %v984_v56, %v992_v48  ;;  %v1012_v23 = vor.u32 %v1011_v3, %v1008_v19  ;;  %v1026_v44 = vshrl.u32 %v1694_v28, 16 }
 0x1f7   :  { %v938_v21 = vsel %vm508_vm3, %v926_v62, %v914_v60  ;;  %v1003_v8 = vsel %vm2237_vm9, %v994_v61, %v1002_v58  ;;  %v1018_v5 = vrot.slane %v1016_v4, 5  ;;  %v1021_v11 = vrot.slane %v1019_v6, 6  ;;  %v916_v26 = vpop.permute.xlu0 %915 }
 0x1f8   :  { %v1695_v12 = vcombine.low %v938_v21, %v938_v21  ;;  %v1702_v22 = vcombine.low %v993_v9, %v1003_v8  ;;  %v1696_v24 = vcombine.high %v938_v21, %v938_v21  ;;  %v1004_v35 = vrot.slane %v1002_v58, 4 }
 0x1f9   :  { %v888_v7 = vpop.permute.xlu1 %887  ;;  %v1022_v32 = vor.u32 %v1021_v11, %v1018_v5  ;;  %v1014_v38 = vrot.slane %v1012_v23, 4  ;;  %v1029_v45 = vshll.u32 %v1694_v28, 16  ;;  %v1028_v55 = vrot.slane %v1026_v44, 5 }
 0x1fa   :  { %v928_v20 = vsel %vm491_vm2, %v2202_v52, %v888_v7  ;;  %v1035_v25 = vshrl.u32 %v1695_v12, 16  ;;  %v1038_v0 = vshll.u32 %v1695_v12, 16  ;;  %1799 = vmatmul.mubr.msk.bf16.vlgmr.msra.gmra.mrb[0].mxu1 %vm643_vm5, %v1702_v22  ;;  %v1044_v41 = vshrl.u32 %v1696_v24, 16 }
 0x1fb   :  { %v940_v30 = vsel %vm508_vm3, %v928_v20, %v916_v26  ;;  %1802 = vmatprep.mubr.msk.bf16.mxu1 %vm1871_vm6, %v1870_v49  ;;  %v1047_v39 = vshll.u32 %v1696_v24, 16  ;;  %v918_v48 = vpop.permute.xlu0 %917  ;;  %v1023_v42 = vsel %vm2237_vm9, %v1014_v38, %v1022_v32  ;;  %v1013_v10 = vsel %vm2237_vm9, %v1004_v35, %v1012_v23 }
 0x1fc   :  { %v1037_v33 = vrot.slane %v1035_v25, 5  ;;  %v1040_v34 = vrot.slane %v1038_v0, 6  ;;  %v1697_v52 = vcombine.low %v940_v30, %v940_v30  ;;  %v1046_v53 = vrot.slane %v1044_v41, 5 }
 0x1fd   :  { %v890_v31 = vpop.permute.xlu1 %889  ;;  %v1049_v37 = vrot.slane %v1047_v39, 6  ;;  %v1698_v54 = vcombine.high %v940_v30, %v940_v30  ;;  %v1031_v56 = vrot.slane %v1029_v45, 6  ;;  %v1024_v62 = vrot.slane %v1022_v32, 4 }
 0x1fe   :  { %v930_v43 = vsel %vm491_vm2, %v2198_v50, %v890_v31  ;;  %v1041_v16 = vor.u32 %v1040_v34, %v1037_v33  ;;  %v1054_v46 = vshrl.u32 %v1697_v52, 16  ;;  %v1057_v47 = vshll.u32 %v1697_v52, 16 }
 0x1ff   :  { %v942_v51 = vsel %vm508_vm3, %v930_v43, %v918_v48  ;;  %v1703_v50 = vcombine.low %v1013_v10, %v1023_v42  ;;  %v1050_v19 = vor.u32 %v1049_v37, %v1046_v53  ;;  %v1064_v3 = vshrl.u32 %v1698_v54, 16 }
 0x200   :  { %v1042_v58 = vrot.slane %v1041_v16, 4  ;;  %v1056_v59 = vrot.slane %v1054_v46, 5  ;;  %v1059_v60 = vrot.slane %v1057_v47, 6  ;;  %v1699_v61 = vcombine.low %v942_v51, %v942_v51  ;;  %v1861_v16 = vld [vmem:[%s2468_s10] sm:$0xff]   ;;  %v1862_v46 = vld [vmem:[%s2468_s10 + $0x8] sm:$0xff]  }
 0x201   :  { %v1067_v4 = vshll.u32 %v1698_v54, 16  ;;  %v1032_v6 = vor.u32 %v1031_v56, %v1028_v55  ;;  %v1066_v11 = vrot.slane %v1064_v3, 5  ;;  %v1700_v9 = vcombine.high %v942_v51, %v942_v51  ;;  %1818 = vmatprep.subr.bf16.mxu0 %v1861_v16  ;;  %v2292_v47 = vld [vmem:[%s2467_s9] ss:$0 sm:$0xff] }
 0x202   :  { %1803 = vmatmul.mubr.msk.bf16.gmra.mrb[4].mxu1 %vm643_vm5, %v1703_v50  ;;  %v1060_v21 = vor.u32 %v1059_v60, %v1056_v59  ;;  %v1074_v7 = vshrl.u32 %v1699_v61, 16  ;;  %v1077_v8 = vshll.u32 %v1699_v61, 16  ;;  %v1051_v5 = vsel %vm2237_vm9, %v1042_v58, %v1050_v19  ;;  %1819 = vmatpush3.bf16.msra.mxu0 %v1861_v16 }
 0x203   :  { %1806 = vmatprep.mubr.msk.bf16.mxu1 %vm1871_vm6, %v1870_v49  ;;  %v1069_v12 = vrot.slane %v1067_v4, 6  ;;  %v1033_v20 = vsel %vm2237_vm9, %v1024_v62, %v1032_v6  ;;  %v1084_v26 = vshrl.u32 %v1700_v9, 16  ;;  %v1087_v28 = vshll.u32 %v1700_v9, 16  ;;  %1820 = vmatprep.subr.bf16.mxu0 %v1862_v46 }
 0x204   :  { %v1704_v22 = vcombine.low %v1033_v20, %v1051_v5  ;;  %v1062_v23 = vrot.slane %v1060_v21, 4  ;;  %v1076_v24 = vrot.slane %v1074_v7, 5  ;;  %v1079_v25 = vrot.slane %v1077_v8, 6 }
 0x205   :  { %v1070_v0 = vor.u32 %v1069_v12, %v1066_v11  ;;  %v1052_v30 = vrot.slane %v1050_v19, 4  ;;  %v1086_v33 = vrot.slane %v1084_v26, 5  ;;  %v1089_v34 = vrot.slane %v1087_v28, 6 }
 0x206   :  { %v1080_v31 = vor.u32 %v1079_v25, %v1076_v24  ;;  %1821 = vmatpush3.bf16.msra.mxu0 %v1862_v46  ;;  %v1254_v48 = vrot.slane %v2102_v15, 4  ;;  %v1256_v60 = vrot.slane %v2109_v17, 4  ;;  %v1258_v62 = vrot.slane %v2116_v1, 4 }
 0x207   :  { %v1071_v32 = vsel %vm2237_vm9, %v1062_v23, %v1070_v0  ;;  %v1061_v35 = vsel %vm2237_vm9, %v1052_v30, %v1060_v21  ;;  %v1090_v41 = vor.u32 %v1089_v34, %v1086_v33  ;;  %v1072_v39 = vrot.slane %v1070_v0, 4 }
 0x208   :  { %v1705_v52 = vcombine.low %v1061_v35, %v1071_v32  ;;  %v1082_v38 = vrot.slane %v1080_v31, 4  ;;  %v1257_v6 = vsel %vm1250_vm10, %v1254_v48, %v1256_v60  ;;  %v1259_v11 = vsel %vm1250_vm10, %v1256_v60, %v1258_v62 }
 0x209   :  { %v1081_v44 = vsel %vm2237_vm9, %v1072_v39, %v1080_v31  ;;  %v1260_v20 = vrot.slane %v2123_v29, 4  ;;  %v1864_v31 = vld [vmem:[%s2468_s10 + $0x18] sm:$0xff]   ;;  %v1262_v29 = vrot.slane %v2127_v36, 4  ;;  %v1263_v32 = vrot.slane %v2136_v40, 4 }
 0x20a   :  { %1807 = vmatmul.mubr.msk.bf16.gmra.mrb[8].mxu1 %vm643_vm5, %v1704_v22  ;;  %v1091_v43 = vsel %vm2237_vm9, %v1082_v38, %v1090_v41  ;;  %v1863_v22 = vld [vmem:[%s2468_s10 + $0x10] sm:$0xff]  }
 0x20b   :  { %1810 = vmatprep.mubr.msk.bf16.mxu1 %vm1871_vm6, %v1870_v49  ;;  %v1706_v45 = vcombine.low %v1081_v44, %v1091_v43  ;;  %1822 = vmatprep.subr.bf16.mxu0 %v1863_v22  ;;  %v1261_v33 = vsel %vm1250_vm10, %v1258_v62, %v1260_v20 }
 0x20c   :  { %1823 = vmatpush3.bf16.msra.mxu0 %v1863_v22  ;;  %v1271_v22 = vrot.slane %v2182_v27, 4 }
 0x20d   :  { %1824 = vmatprep.subr.bf16.mxu0 %v1864_v31 }
 0x210   :  { %1825 = vmatpush3.bf16.msra.mxu0 %v1864_v31 }
 0x212   :  { %1811 = vmatmul.mubr.msk.bf16.gmra.mrb[12].mxu1 %vm643_vm5, %v1705_v52 }
 0x213   :  { %1814 = vmatprep.mubr.msk.bf16.mxu1 %vm1871_vm6, %v1870_v49  ;;  %v1252_v49 = vrot.slane %v2098_v13, 4 }
 0x215   :  { %v1253_v37 = vsel %vm1250_vm10, %v1251_v2, %v1252_v49  ;;  %v1255_v14 = vsel %vm1250_vm10, %v1252_v49, %v1254_v48  ;;  %v1265_v49 = vrot.slane %v2152_v57, 4  ;;  %v1865_v2 = vld [vmem:[%s2468_s10 + $0x20] sm:$0xff]  }
 0x216   :  { %1826 = vmatprep.subr.bf16.mxu0 %v1865_v2 }
 0x217   :  { %1827 = vmatpush3.bf16.msra.mxu0 %v1865_v2 }
 0x21a   :  { %1815 = vmatmul.mubr.msk.bf16.gmra.mrb[16].mxu1 %vm643_vm5, %v1706_v45 }
 0x2cd   :  { %v1211_v42 = vpop.f32.mrb[0].mxu1 }
 0x2ce   :  { %v1212_v51 = vadd.f32 %v2292_v47, %v1211_v42  ;;  %v1800_v53 = vpop.f32.mrb[1].mxu1  ;;  %v1264_v42 = vsel %vm1250_vm10, %v1262_v29, %v1263_v32 }
 0x2cf   :  { %v1214_v54 = vpop.f32.mrb[2].mxu1 }
 0x2d0   :  { %v1283_v10 = vmul.f32 %v1253_v37, %v1212_v51  ;;  %v1215_v55 = vadd.f32 %v2292_v47, %v1214_v54  ;;  %v1801_v56 = vpop.f32.mrb[3].mxu1 }
 0x2d2   :  { %v1284_v50 = vmul.f32 %v1255_v14, %v1215_v55  ;;  %v1293_v58 = vmax.f32 %v1283_v10, 0.0 }
 0x2d4   :  { %v1294_v59 = vmax.f32 %v1284_v50, 0.0  ;;  %v1866_v50 = vld [vmem:[%s2468_s10 + $0x28] sm:$0xff]  }
 0x2d5   :  { %v1219_v19 = vpop.f32.mrb[4].mxu1  ;;  %1828 = vmatprep.subr.bf16.mxu0 %v1866_v50 }
 0x2d6   :  { %v2300_v61 = vpack.c.bf16 %v1294_v59, %v1293_v58  ;;  %v1220_v3 = vadd.f32 %v2292_v47, %v1219_v19  ;;  %v1804_v4 = vpop.f32.mrb[5].mxu1  ;;  %v1266_v58 = vsel %vm1250_vm10, %v1263_v32, %v1265_v49  ;;  %1829 = vmatpush3.bf16.msra.mxu0 %v1866_v50 }
 0x2d7   :  { %v1222_v21 = vpop.f32.mrb[6].mxu1 }
 0x2d8   :  { %v1285_v7 = vmul.f32 %v1257_v6, %v1220_v3  ;;  %v1223_v8 = vadd.f32 %v2292_v47, %v1222_v21  ;;  %v1805_v5 = vpop.f32.mrb[7].mxu1  ;;  %v1312_v9 = vshll.u32 %v2300_v61, 16  ;;  %v1373_v35 = vrot.slane %v2300_v61, 1 }
 0x2d9   :  { %v1310_v39 = vshrl.u32 %v2300_v61, 16  ;;  %v1267_v21 = vrot.slane %v2159_v63, 4 }
 0x2da   :  { %v1286_v12 = vmul.f32 %v1259_v11, %v1223_v8  ;;  %v1295_v23 = vmax.f32 %v1285_v7, 0.0  ;;  %v1314_v30 = vrot.slane %v1312_v9, 1  ;;  %v1269_v9 = vrot.slane %v2171_v18, 4 }
 0x2dc   :  { %v1296_v24 = vmax.f32 %v1286_v12, 0.0  ;;  %v1315_v16 = vor.u32 %v1314_v30, %v1310_v39  ;;  %v1270_v30 = vsel %vm1250_vm10, %v1267_v21, %v1269_v9  ;;  %v1272_v27 = vsel %vm1250_vm10, %v1269_v9, %v1271_v22 }
 0x2dd   :  { %v1227_v25 = vpop.f32.mrb[8].mxu1 }
 0x2de   :  { %v2312_v0 = vpack.c.bf16 %v1296_v24, %v1295_v23  ;;  %v1228_v26 = vadd.f32 %v2292_v47, %v1227_v25  ;;  %v1808_v28 = vpop.f32.mrb[9].mxu1  ;;  %v1268_v23 = vsel %vm1250_vm10, %v1265_v49, %v1267_v21 }
 0x2df   :  { %v1230_v34 = vpop.f32.mrb[10].mxu1 }
 0x2e0   :  { %v1287_v52 = vmul.f32 %v1261_v33, %v1228_v26  ;;  %v1809_v38 = vpop.f32.mrb[11].mxu1  ;;  %v1374_v41 = vrot.slane %v2312_v0, 1  ;;  %v1317_v43 = vshll.u32 %v2312_v0, 16  ;;  %v1231_v44 = vadd.f32 %v2292_v47, %v1230_v34 }
 0x2e1   :  { %v1321_v54 = vshrl.u32 %v2312_v0, 16 }
 0x2e2   :  { %v1297_v45 = vmax.f32 %v1287_v52, 0.0  ;;  %v1375_v36 = vsel %vm460_vm0, %v1373_v35, %v1374_v41  ;;  %v1319_v46 = vrot.slane %v1317_v43, 1  ;;  %v1288_v53 = vmul.f32 %v1264_v42, %v1231_v44 }
 0x2e3   :  { %1383 = vrot.lane.b32.xlu0 %v1375_v36, %s1868_s27 }
 0x2e4   :  { %v2332_v48 = vpack.c.bf16 %v1297_v45, %v1297_v45  ;;  %v1320_v51 = vsel %vm381_vm1, %v1315_v16, %v1319_v46  ;;  %v1323_v60 = vor.u32 %v1321_v54, %v1319_v46  ;;  %v1298_v7 = vmax.f32 %v1288_v53, 0.0 }
 0x2e5   :  { %1355 = vrot.lane.b32.xlu1 %v1320_v51, %s1869_s0  ;;  %v1235_v37 = vpop.f32.mrb[12].mxu1 }
 0x2e6   :  { %v1236_v10 = vadd.f32 %v2292_v47, %v1235_v37  ;;  %v1812_v55 = vpop.f32.mrb[13].mxu1  ;;  %v1376_v56 = vrot.slane %v2332_v48, 1  ;;  %v1325_v14 = vshll.u32 %v2332_v48, 16  ;;  %v1329_v6 = vshrl.u32 %v2332_v48, 16 }
 0x2e7   :  { %v1238_v59 = vpop.f32.mrb[14].mxu1 }
 0x2e8   :  { %v1289_v62 = vmul.f32 %v1266_v58, %v1236_v10  ;;  %1387 = vrot.lane.b32.xlu0 %v1376_v56, %s1868_s27  ;;  %v1813_v19 = vpop.f32.mrb[15].mxu1  ;;  %v1377_v3 = vsel %vm460_vm0, %v1374_v41, %v1376_v56  ;;  %v1327_v4 = vrot.slane %v1325_v14, 1  ;;  %v1239_v5 = vadd.f32 %v2292_v47, %v1238_v59 }
 0x2e9   :  { %1385 = vrot.lane.b32.xlu1 %v1377_v3, %s1868_s27 }
 0x2ea   :  { %v1299_v8 = vmax.f32 %v1289_v62, 0.0  ;;  %v1328_v11 = vsel %vm381_vm1, %v1323_v60, %v1327_v4  ;;  %v1331_v12 = vor.u32 %v1329_v6, %v1327_v4  ;;  %v1290_v25 = vmul.f32 %v1268_v23, %v1239_v5 }
 0x2ec   :  { %v2353_v20 = vpack.c.bf16 %v1299_v8, %v1298_v7  ;;  %1357 = vrot.lane.b32.xlu0 %v1328_v11, %s1869_s0  ;;  %v1300_v35 = vmax.f32 %v1290_v25, 0.0 }
 0x2ed   :  { %1359 = vrot.lane.b32.xlu1 %v1331_v12, %s1869_s0  ;;  %v1243_v24 = vpop.f32.mrb[16].mxu1 }
 0x2ee   :  { %v1244_v26 = vadd.f32 %v2292_v47, %v1243_v24  ;;  %v1816_v28 = vpop.f32.mrb[17].mxu1  ;;  %v1335_v29 = vshll.u32 %v2353_v20, 16  ;;  %v1333_v44 = vshrl.u32 %v2353_v20, 16  ;;  %v1378_v36 = vrot.slane %v2353_v20, 1 }
 0x2ef   :  { %v1246_v31 = vpop.f32.mrb[18].mxu1 }
 0x2f0   :  { %v1291_v32 = vmul.f32 %v1270_v30, %v1244_v26  ;;  %v1247_v33 = vadd.f32 %v2292_v47, %v1246_v31  ;;  %v1817_v34 = vpop.f32.mrb[19].mxu1  ;;  %v1337_v41 = vrot.slane %v1335_v29, 1 }
 0x2f2   :  { %v1301_v52 = vmax.f32 %v1291_v32, 0.0  ;;  %v1292_v38 = vmul.f32 %v1272_v27, %v1247_v33  ;;  %v1338_v46 = vor.u32 %v1337_v41, %v1333_v44 }
 0x2f4   :  { %v2364_v39 = vpack.c.bf16 %v1301_v52, %v1300_v35  ;;  %v1302_v43 = vmax.f32 %v1292_v38, 0.0 }
 0x2f6   :  { %v2367_v45 = vpack.c.bf16 %v1302_v43, %v1302_v43  ;;  %v1379_v16 = vrot.slane %v2364_v39, 1  ;;  %v1340_v47 = vshll.u32 %v2364_v39, 16  ;;  %v1344_v42 = vshrl.u32 %v2364_v39, 16 }
 0x2f8   :  { %v1380_v49 = vsel %vm460_vm0, %v1378_v36, %v1379_v16  ;;  %v1342_v2 = vrot.slane %v1340_v47, 1  ;;  %v1348_v51 = vshll.u32 %v2367_v45, 16  ;;  %v1352_v10 = vshrl.u32 %v2367_v45, 16 }
 0x2f9   :  { %1389 = vrot.lane.b32.xlu0 %v1380_v49, %s1868_s27  ;;  %v1381_v14 = vrot.slane %v2367_v45, 1 }
 0x2fa   :  { %v1343_v53 = vsel %vm381_vm1, %v1338_v46, %v1342_v2  ;;  %v1346_v37 = vor.u32 %v1344_v42, %v1342_v2  ;;  %v1350_v54 = vrot.slane %v1348_v51, 1 }
 0x2fb   :  { %1361 = vrot.lane.b32.xlu1 %v1343_v53, %s1869_s0  ;;  %v1382_v50 = vsel %vm460_vm0, %v1379_v16, %v1381_v14 }
 0x2fc   :  { %v1351_v55 = vsel %vm381_vm1, %v1346_v37, %v1350_v54  ;;  %v1354_v56 = vor.u32 %v1352_v10, %v1350_v54 }
 0x2fd   :  { %1363 = vrot.lane.b32.xlu0 %v1351_v55, %s1869_s0 }
 0x2ff   :  { %1365 = vrot.lane.b32.xlu1 %v1354_v56, %s1869_s0 }
 0x301   :  { %1393 = vrot.lane.b32.xlu0 %v1381_v14, %s1868_s27 }
 0x303   :  { %1391 = vrot.lane.b32.xlu1 %v1382_v50, %s1868_s27 }
 0x355   :  { %v1384_v58 = vpop.permute.xlu0 %1383 }
 0x357   :  { %v1356_v59 = vpop.permute.xlu1 %1355 }
 0x358   :  { %v1396_v60 = vsel %vm491_vm2, %v2300_v61, %v1356_v59 }
 0x359   :  { %v1408_v62 = vsel %vm508_vm3, %v1396_v60, %v1384_v58  ;;  %v1718_v60 = vld [vmem:[%s2469_s11] ss:$0 sm:$0xff] }
 0x35a   :  { %v1388_v19 = vpop.permute.xlu0 %1387  ;;  %v1420_v4 = vshrl.u32 %v1408_v62, 16  ;;  %v1423_v6 = vshll.u32 %v1408_v62, 16 }
 0x35b   :  { %v1386_v3 = vpop.permute.xlu1 %1385 }
 0x35c   :  { %v1422_v5 = vrot.slane %v1420_v4, 1  ;;  %v1425_v9 = vrot.slane %v1423_v6, 2  ;;  %v1606_v4 = vstv %s2470_s12 }
 0x35e   :  { %v1358_v21 = vpop.permute.xlu0 %1357 }
 0x35f   :  { %v1398_v7 = vsel %vm491_vm2, %v2312_v0, %v1358_v21  ;;  %v1360_v8 = vpop.permute.xlu1 %1359  ;;  %v1426_v0 = vor.u32 %v1425_v9, %v1422_v5 }
 0x360   :  { %v1410_v11 = vsel %vm508_vm3, %v1398_v7, %v1386_v3  ;;  %v1400_v12 = vsel %vm491_vm2, %v2332_v48, %v1360_v8 }
 0x361   :  { %v1427_v22 = vshrl.u32 %v1410_v11, 16  ;;  %v1430_v61 = vshll.u32 %v1410_v11, 16  ;;  %v1412_v23 = vsel %vm508_vm3, %v1400_v12, %v1388_v19 }
 0x362   :  { %v1435_v24 = vshrl.u32 %v1412_v23, 16  ;;  %v1438_v25 = vshll.u32 %v1412_v23, 16 }
 0x363   :  { %v1429_v26 = vrot.slane %v1427_v22, 1  ;;  %v1432_v28 = vrot.slane %v1430_v61, 2 }
 0x364   :  { %v1437_v30 = vrot.slane %v1435_v24, 1  ;;  %v1440_v31 = vrot.slane %v1438_v25, 2 }
 0x365   :  { %v1433_v29 = vor.u32 %v1432_v28, %v1429_v26 }
 0x366   :  { %v1441_v32 = vor.u32 %v1440_v31, %v1437_v30 }
 0x367   :  { %v1434_v33 = vsel %vm1419_vm11, %v1426_v0, %v1433_v29 }
 0x368   :  { %1830 = vmatprep.mubr.msk.bf16.mxu0 %vm643_vm5, %v1434_v33  ;;  %v1442_v48 = vsel %vm1419_vm11, %v1433_v29, %v1441_v32 }
 0x369   :  { %1831 = vmatmul.mubr.msk.bf16.vlgmr.msra.gmra.mrb[12].mxu0 %vm643_vm5, %v1442_v48 }
 0x36b   :  { %v1390_v34 = vpop.permute.xlu0 %1389 }
 0x36d   :  { %v1362_v27 = vpop.permute.xlu1 %1361 }
 0x36e   :  { %v1402_v35 = vsel %vm491_vm2, %v2353_v20, %v1362_v27 }
 0x36f   :  { %v1414_v52 = vsel %vm508_vm3, %v1402_v35, %v1390_v34  ;;  %v1364_v38 = vpop.permute.xlu0 %1363 }
 0x370   :  { %v1443_v43 = vshrl.u32 %v1414_v52, 16  ;;  %v1446_v44 = vshll.u32 %v1414_v52, 16  ;;  %v1404_v46 = vsel %vm491_vm2, %v2364_v39, %v1364_v38 }
 0x371   :  { %v1366_v41 = vpop.permute.xlu1 %1365 }
 0x372   :  { %v1406_v36 = vsel %vm491_vm2, %v2367_v45, %v1366_v41  ;;  %v1445_v51 = vrot.slane %v1443_v43, 1  ;;  %v1448_v20 = vrot.slane %v1446_v44, 2 }
 0x373   :  { %v1394_v16 = vpop.permute.xlu0 %1393 }
 0x374   :  { %v1418_v47 = vsel %vm508_vm3, %v1406_v36, %v1394_v16  ;;  %v1449_v45 = vor.u32 %v1448_v20, %v1445_v51 }
 0x375   :  { %v1458_v49 = vshrl.u32 %v1418_v47, 16  ;;  %v1461_v2 = vshll.u32 %v1418_v47, 16  ;;  %v1392_v42 = vpop.permute.xlu1 %1391 }
 0x376   :  { %v1416_v53 = vsel %vm508_vm3, %v1404_v46, %v1392_v42 }
 0x377   :  { %v1460_v37 = vrot.slane %v1458_v49, 1  ;;  %v1463_v54 = vrot.slane %v1461_v2, 2  ;;  %v1450_v10 = vshrl.u32 %v1416_v53, 16  ;;  %v1453_v55 = vshll.u32 %v1416_v53, 16 }
 0x379   :  { %v1452_v56 = vrot.slane %v1450_v10, 1  ;;  %v1455_v14 = vrot.slane %v1453_v55, 2  ;;  %v1464_v50 = vor.u32 %v1463_v54, %v1460_v37 }
 0x37b   :  { %v1456_v58 = vor.u32 %v1455_v14, %v1452_v56 }
 0x37d   :  { %v1457_v59 = vsel %vm1419_vm11, %v1449_v45, %v1456_v58  ;;  %v1465_v39 = vsel %vm1419_vm11, %v1456_v58, %v1464_v50 }
 0x37e   :  { %1834 = vmatprep.mubr.msk.bf16.mxu0 %vm643_vm5, %v1457_v59 }
 0x37f   :  { %1835 = vmatmul.mubr.msk.bf16.gmra.mrb[16].mxu0 %vm643_vm5, %v1465_v39 }
 0x43c   :  { %v1832_v62 = vpop.f32.mrb[12].mxu0 }
 0x43d   :  { %v1576_v19 = vadd.f32 %v1832_v62, %v1718_v60  ;;  %v1567_v3 = vpop.f32.mrb[13].mxu0 }
 0x43e   :  { %v1568_v6 = vadd.f32 %v1718_v60, %v1567_v3  ;;  %v1833_v21 = vpop.f32.mrb[14].mxu0 }
 0x43f   :  { %v1600_v7 = vmul.f32 %v1576_v19, %v2109_v17  ;;  %v1579_v8 = vadd.f32 %v1833_v21, %v1718_v60  ;;  %v1570_v5 = vpop.f32.mrb[15].mxu0 }
 0x440   :  { %v1598_v11 = vmul.f32 %v1568_v6, %v2098_v13  ;;  %v1571_v12 = vadd.f32 %v1718_v60, %v1570_v5 }
 0x441   :  { %v1609_v9 = vmul.f32 %v1606_v4, %v1600_v7  ;;  %v1601_v22 = vmul.f32 %v1579_v8, %v2116_v1 }
 0x442   :  { %v1607_v61 = vmul.f32 %v1606_v4, %v1598_v11  ;;  %v1599_v23 = vmul.f32 %v1571_v12, %v2102_v15 }
 0x443   :  { %v1617_v24 = vmax.f32 %v1609_v9, 0.0  ;;  %v1610_v25 = vmul.f32 %v1606_v4, %v1601_v22 }
 0x444   :  { %v1615_v26 = vmax.f32 %v1607_v61, 0.0  ;;  %v1608_v28 = vmul.f32 %v1606_v4, %v1599_v23 }
 0x445   :  { %1626 = vst.msk [vmem:[%s2471_s13 + $0x10] sm:$0xff] %vm1623_vm12, %v1617_v24  ;;  %v1618_v17 = vmax.f32 %v1610_v25, 0.0 }
 0x446   :  { %1624 = vst.msk [vmem:[%s2471_s13] sm:$0xff] %vm1623_vm12, %v1615_v26  ;;  %v1616_v13 = vmax.f32 %v1608_v28, 0.0 }
 0x447   :  { %1627 = vst.msk [vmem:[%s2471_s13 + $0x18] sm:$0xff] %vm1623_vm12, %v1618_v17 }
 0x448   :  { %1625 = vst.msk [vmem:[%s2471_s13 + $0x8] sm:$0xff] %vm1623_vm12, %v1616_v13 }
 0x452   :  { %v1836_v15 = vpop.f32.mrb[16].mxu0 }
 0x453   :  { %v1592_v1 = vadd.f32 %v1836_v15, %v1718_v60  ;;  %v1583_v30 = vpop.f32.mrb[17].mxu0 }
 0x454   :  { %v1584_v31 = vadd.f32 %v1718_v60, %v1583_v30  ;;  %v1837_v0 = vpop.f32.mrb[18].mxu0 }
 0x455   :  { %v1604_v29 = vmul.f32 %v1592_v1, %v2159_v63  ;;  %v1595_v32 = vadd.f32 %v1837_v0, %v1718_v60  ;;  %v1586_v33 = vpop.f32.mrb[19].mxu0 }
 0x456   :  { %v1602_v48 = vmul.f32 %v1584_v31, %v2136_v40  ;;  %v1587_v34 = vadd.f32 %v1718_v60, %v1586_v33 }
 0x457   :  { %v1613_v27 = vmul.f32 %v1606_v4, %v1604_v29  ;;  %v1605_v35 = vmul.f32 %v1595_v32, %v2171_v18 }
 0x458   :  { %v1611_v52 = vmul.f32 %v1606_v4, %v1602_v48  ;;  %v1603_v38 = vmul.f32 %v1587_v34, %v2152_v57 }
 0x459   :  { %v1621_v41 = vmax.f32 %v1613_v27, 0.0  ;;  %v1614_v43 = vmul.f32 %v1606_v4, %v1605_v35 }
 0x45a   :  { %v1619_v44 = vmax.f32 %v1611_v52, 0.0  ;;  %v1612_v36 = vmul.f32 %v1606_v4, %v1603_v38 }
 0x45b   :  { %1630 = vst.msk [vmem:[%s2471_s13 + $0x30] sm:$0xff] %vm1623_vm12, %v1621_v41  ;;  %v1622_v63 = vmax.f32 %v1614_v43, 0.0 }
 0x45c   :  { %1628 = vst.msk [vmem:[%s2471_s13 + $0x20] sm:$0xff] %vm1623_vm12, %v1619_v44  ;;  %v1620_v40 = vmax.f32 %v1612_v36, 0.0 }
 0x45d   :  { %1631 = vst.msk [vmem:[%s2471_s13 + $0x38] sm:$0xff] %vm1623_vm12, %v1622_v63 }
 0x45e   :  { %1629 = vst.msk [vmem:[%s2471_s13 + $0x28] sm:$0xff] %vm1623_vm12, %v1620_v40 }

</bundles_post_ra>
